<compile_context>
chip_gen: v7x
topology: tpu7x:2x2x1
jax: 0.10.0
libtpu: 0.0.40
codegen_flags: <defaults>
</compile_context>

<pallas_src>
import functools

import jax
import jax.numpy as jnp
from jax.experimental import pallas as pl
from jax.experimental.pallas import tpu as pltpu

BN_EPS = 1e-5          # nn.BatchNorm2d default
LEAKY_SLOPE = 0.01     # nn.LeakyReLU default


def _vmem_limit(block_bytes):
    # double-buffered pipeline blocks + headroom, clamped to a safe range.
    return int(min(64 * 2**20, max(24 * 2**20, 4 * block_bytes)))


def _conv_stats_kernel(H, W, x_ref, w_ref, b_ref, ml_ref, mr_ref,
                       y_ref, sum_ref, ssq_ref, xp_ref, patch_ref):
    """3x3 / stride-1 / pad-1 conv (+bias) for one image, plus per-image
    BatchNorm partial sums.

    Layout: pixels are folded onto the lane axis (H*W lanes), channels on the
    sublane axis.  Tap (dy, dx) of the stencil is then just a lane-shifted
    window of the flat, zero-haloed image; taps that cross a row edge are
    zeroed with precomputed column masks.  The 9 taps are stacked on the
    contraction axis so the MXU sees one K = 9*Cin matmul.
    """
    Cin = x_ref.shape[0]
    HW = H * W
    L = W + 1                                   # flat zero halo on each side

    # Zero-haloed, W-folded image built in VMEM (no wrapper jnp.pad / extra
    # HBM round trip of x).
    xp_ref[...] = jnp.zeros_like(xp_ref)
    xp_ref[:, L:L + HW] = x_ref[...]

    # im2col patch (9*Cin, H*W) assembled from static ref slices (lane-shifted
    # windows) -> no full-value materialization, no relayout copies.
    for dy in range(3):
        for dx in range(3):
            t = dy * 3 + dx
            tap = xp_ref[:, dy * W + dx: dy * W + dx + HW]      # (Cin, HW)
            if dx == 0:
                tap = tap * ml_ref[...]          # zero wrapped-around columns
            elif dx == 2:
                tap = tap * mr_ref[...]
            patch_ref[t * Cin:(t + 1) * Cin, :] = tap

    # Single MXU contraction: (Cout, 9*Cin) x (9*Cin, HW), bf16 in / f32 acc.
    acc = jnp.dot(w_ref[...], patch_ref[...],
                  preferred_element_type=jnp.float32)            # (Cout, HW)
    acc = acc + b_ref[...]                                       # (Cout, 1)

    y_ref[...] = acc.astype(y_ref.dtype)
    # Single-pass BN partials (sum, sum of squares), f32, reduced over lanes.
    sum_ref[...] = jnp.sum(acc, axis=1, keepdims=True)
    ssq_ref[...] = jnp.sum(acc * acc, axis=1, keepdims=True)


def _bn_leakyrelu_kernel(neg_slope, y_ref, scale_ref, shift_ref, o_ref):
    """Lane-dense normalize + LeakyReLU: out = leaky(y * scale + shift)."""
    z = y_ref[...] * scale_ref[...] + shift_ref[...]
    o_ref[...] = jnp.where(z > 0, z, neg_slope * z).astype(o_ref.dtype)


def conv_with_norm(x, w, b, gamma, beta, *, stride=1, padding=1,
                   eps=BN_EPS, negative_slope=LEAKY_SLOPE):
    """ConvWithNorm forward.  x: (N, Cin, H, W) NCHW; w: (Cout, Cin, 3, 3)
    OIHW; b/gamma/beta: (Cout,).  Returns (N, Cout, H, W) float32."""
    N, Cin, H, W = x.shape
    Cout, Cin_w, KH, KW = w.shape
    if (KH, KW) != (3, 3) or stride != 1 or padding != 1:
        # TODO(synk): generalize the lane-folded im2col to other
        # kernel_size / stride / padding combos; this covers the 3x3/s1/p1 case.
        raise NotImplementedError("only kernel_size=3, stride=1, padding=1")
    assert Cin_w == Cin
    HW = H * W
    HWp = HW + 2 * (W + 1)
    K9 = 9 * Cin

    # ---- operands for kernel 1 (conv + BN partial stats) -------------------
    x_flat = x.reshape(N, Cin, HW).astype(jnp.bfloat16)         # free reshape
    w2 = jnp.transpose(w, (0, 2, 3, 1)).reshape(Cout, K9).astype(jnp.bfloat16)
    b2 = b.reshape(Cout, 1).astype(jnp.float32)
    col = jnp.arange(HW, dtype=jnp.int32) % W
    mask_l = (col != 0).astype(jnp.bfloat16).reshape(1, HW)      # dx == 0 taps
    mask_r = (col != W - 1).astype(jnp.bfloat16).reshape(1, HW)  # dx == 2 taps

    blk1 = (Cin * HW * 2 + Cout * K9 * 2 + Cout * 4 + 2 * HW * 2
            + Cout * HW * 4 + 2 * Cout * 4 + Cin * HWp * 2 + K9 * HW * 2)
    conv_fn = pl.pallas_call(
        functools.partial(_conv_stats_kernel, H, W),
        out_shape=(jax.ShapeDtypeStruct((N, Cout, HW), jnp.float32),
                   jax.ShapeDtypeStruct((N, Cout, 1), jnp.float32),
                   jax.ShapeDtypeStruct((N, Cout, 1), jnp.float32)),
        grid_spec=pltpu.PrefetchScalarGridSpec(
            num_scalar_prefetch=0,
            grid=(N,),
            in_specs=[
                pl.BlockSpec((None, Cin, HW), lambda n: (n, 0, 0)),
                pl.BlockSpec((Cout, K9), lambda n: (0, 0)),
                pl.BlockSpec((Cout, 1), lambda n: (0, 0)),
                pl.BlockSpec((1, HW), lambda n: (0, 0)),
                pl.BlockSpec((1, HW), lambda n: (0, 0)),
            ],
            out_specs=(
                pl.BlockSpec((None, Cout, HW), lambda n: (n, 0, 0)),
                pl.BlockSpec((None, Cout, 1), lambda n: (n, 0, 0)),
                pl.BlockSpec((None, Cout, 1), lambda n: (n, 0, 0)),
            ),
            scratch_shapes=[pltpu.VMEM((Cin, HWp), jnp.bfloat16),
                            pltpu.VMEM((K9, HW), jnp.bfloat16)]),
        compiler_params=pltpu.CompilerParams(
            dimension_semantics=("parallel",),
            vmem_limit_bytes=_vmem_limit(blk1)),
    )
    y, psum, pssq = conv_fn(x_flat, w2, b2, mask_l, mask_r)

    # ---- global BN statistics (tiny (N, Cout, 1) reduce, done by XLA) ------
    cnt = jnp.float32(N * HW)
    mean = jnp.sum(psum, axis=0) / cnt                          # (Cout, 1)
    var = jnp.maximum(jnp.sum(pssq, axis=0) / cnt - mean * mean, 0.0)  # biased
    inv = jax.lax.rsqrt(var + eps)
    scale = gamma.reshape(Cout, 1).astype(jnp.float32) * inv
    shift = beta.reshape(Cout, 1).astype(jnp.float32) - mean * scale

    # ---- kernel 2: normalize + LeakyReLU (lane-dense elementwise) ----------
    blk2 = 2 * Cout * HW * 4 + 2 * Cout * 4
    bn_fn = pl.pallas_call(
        functools.partial(_bn_leakyrelu_kernel, float(negative_slope)),
        out_shape=jax.ShapeDtypeStruct((N, Cout, HW), jnp.float32),
        grid_spec=pltpu.PrefetchScalarGridSpec(
            num_scalar_prefetch=0,
            grid=(N,),
            in_specs=[
                pl.BlockSpec((None, Cout, HW), lambda n: (n, 0, 0)),
                pl.BlockSpec((Cout, 1), lambda n: (0, 0)),
                pl.BlockSpec((Cout, 1), lambda n: (0, 0)),
            ],
            out_specs=pl.BlockSpec((None, Cout, HW), lambda n: (n, 0, 0))),
        compiler_params=pltpu.CompilerParams(
            dimension_semantics=("parallel",),
            vmem_limit_bytes=_vmem_limit(blk2)),
    )
    out = bn_fn(y, scale, shift)
    return out.reshape(N, Cout, H, W)                            # free reshape


def _reference(x, w, b, gamma, beta, *, eps=BN_EPS, neg=LEAKY_SLOPE):
    """Pure-JAX (f32) reference: Conv2d -> BatchNorm2d (batch stats) -> LeakyReLU."""
    y = jax.lax.conv_general_dilated(
        x, w, window_strides=(1, 1), padding=((1, 1), (1, 1)),
        dimension_numbers=("NCHW", "OIHW", "NCHW"))
    y = y + b.reshape(1, -1, 1, 1)
    m = jnp.mean(y, axis=(0, 2, 3), keepdims=True)
    v = jnp.mean((y - m) ** 2, axis=(0, 2, 3), keepdims=True)
    yn = ((y - m) * jax.lax.rsqrt(v + eps) * gamma.reshape(1, -1, 1, 1)
          + beta.reshape(1, -1, 1, 1))
    return jnp.where(yn > 0, yn, neg * yn)


if __name__ == "__main__":
    N, Cin, Cout, H, W = 2, 4, 8, 16, 16
    key = jax.random.PRNGKey(0)
    kx, kw, kb = jax.random.split(key, 3)
    x = jax.random.normal(kx, (N, Cin, H, W), dtype=jnp.float32)
    bound = 1.0 / (Cin * 9) ** 0.5                 # nn.Conv2d-style init bound
    w = jax.random.uniform(kw, (Cout, Cin, 3, 3), jnp.float32, -bound, bound)
    b = jax.random.uniform(kb, (Cout,), jnp.float32, -bound, bound)
    gamma = jnp.ones((Cout,), jnp.float32)         # BatchNorm2d default affine
    beta = jnp.zeros((Cout,), jnp.float32)

    out = conv_with_norm(x, w, b, gamma, beta, stride=1, padding=1)
    out = jax.block_until_ready(out)

    ref = _reference(x, w, b, gamma, beta)
    assert out.shape == (N, Cout, H, W)
    err = float(jnp.max(jnp.abs(out - ref)))
    # bf16 matmul operands vs the f32 reference -> slightly loosened tolerance.
    assert jnp.allclose(out, ref, atol=3e-2, rtol=3e-2), f"max abs err {err}"
    print("KERNEL_OK")
</pallas_src>

<mosaic_0001>
module attributes {stable_mosaic.version = 11 : i64} {
  func.func @_conv_stats_kernel(%arg0: i32, %arg1: memref<1x4x256xbf16, #tpu.memory_space<vmem>>, %arg2: memref<8x36xbf16, #tpu.memory_space<vmem>>, %arg3: memref<8x1xf32, #tpu.memory_space<vmem>>, %arg4: memref<1x256xbf16, #tpu.memory_space<vmem>>, %arg5: memref<1x256xbf16, #tpu.memory_space<vmem>>, %arg6: memref<1x8x256xf32, #tpu.memory_space<vmem>>, %arg7: memref<1x8x1xf32, #tpu.memory_space<vmem>>, %arg8: memref<1x8x1xf32, #tpu.memory_space<vmem>>, %arg9: memref<4x290xbf16, #tpu.memory_space<vmem>>, %arg10: memref<36x256xbf16, #tpu.memory_space<vmem>>) attributes {dimension_semantics = [#tpu.dimension_semantics<parallel>], iteration_bounds = array<i64: 2>, scalar_prefetch = 0 : i64, scratch_operands = 2 : i64, tpu.core_type = #tpu.core_type<tc>, window_params = [{transform_indices = @transform_0, window_bounds = array<i64: 1, 4, 256>}, {pipeline_mode = #tpu.pipeline_mode<synchronous>, transform_indices = @transform_1, window_bounds = array<i64: 8, 36>}, {pipeline_mode = #tpu.pipeline_mode<synchronous>, transform_indices = @transform_2, window_bounds = array<i64: 8, 1>}, {pipeline_mode = #tpu.pipeline_mode<synchronous>, transform_indices = @transform_3, window_bounds = array<i64: 1, 256>}, {pipeline_mode = #tpu.pipeline_mode<synchronous>, transform_indices = @transform_4, window_bounds = array<i64: 1, 256>}, {transform_indices = @transform_5, window_bounds = array<i64: 1, 8, 256>}, {transform_indices = @transform_6, window_bounds = array<i64: 1, 8, 1>}, {transform_indices = @transform_7, window_bounds = array<i64: 1, 8, 1>}]} {
    %cst = arith.constant 0.000000e+00 : bf16
    %0 = vector.broadcast %cst : bf16 to vector<4x290xbf16>
    %c0 = arith.constant 0 : index
    %c0_0 = arith.constant 0 : index
    %1 = vector.load %arg9[%c0, %c0_0] : memref<4x290xbf16, #tpu.memory_space<vmem>>, vector<4x290xbf16>
    tpu.vector_store %arg9[%c0, %c0_0], %0 {strides = array<i32>} : memref<4x290xbf16, #tpu.memory_space<vmem>>, vector<4x290xbf16>,
    %c0_1 = arith.constant 0 : index
    %c0_2 = arith.constant 0 : index
    %c0_3 = arith.constant 0 : index
    %2 = vector.load %arg1[%c0_1, %c0_2, %c0_3] : memref<1x4x256xbf16, #tpu.memory_space<vmem>>, vector<1x4x256xbf16>
    %3 = vector.shape_cast %2 : vector<1x4x256xbf16> to vector<4x256xbf16>
    %c0_4 = arith.constant 0 : index
    %c17 = arith.constant 17 : index
    %4 = vector.load %arg9[%c0_4, %c17] : memref<4x290xbf16, #tpu.memory_space<vmem>>, vector<4x256xbf16>
    tpu.vector_store %arg9[%c0_4, %c17], %3 {strides = array<i32>} : memref<4x290xbf16, #tpu.memory_space<vmem>>, vector<4x256xbf16>,
    %c0_5 = arith.constant 0 : index
    %c0_6 = arith.constant 0 : index
    %5 = vector.load %arg9[%c0_5, %c0_6] : memref<4x290xbf16, #tpu.memory_space<vmem>>, vector<4x256xbf16>
    %c0_7 = arith.constant 0 : index
    %c0_8 = arith.constant 0 : index
    %6 = vector.load %arg4[%c0_7, %c0_8] : memref<1x256xbf16, #tpu.memory_space<vmem>>, vector<1x256xbf16>
    %7 = vector.broadcast %6 : vector<1x256xbf16> to vector<4x256xbf16>
    %8 = arith.mulf %5, %7 : vector<4x256xbf16>
    %c0_9 = arith.constant 0 : index
    %c0_10 = arith.constant 0 : index
    %9 = vector.load %arg10[%c0_9, %c0_10] : memref<36x256xbf16, #tpu.memory_space<vmem>>, vector<4x256xbf16>
    tpu.vector_store %arg10[%c0_9, %c0_10], %8 {strides = array<i32>} : memref<36x256xbf16, #tpu.memory_space<vmem>>, vector<4x256xbf16>,
    %c0_11 = arith.constant 0 : index
    %c1 = arith.constant 1 : index
    %10 = vector.load %arg9[%c0_11, %c1] : memref<4x290xbf16, #tpu.memory_space<vmem>>, vector<4x256xbf16>
    %c4 = arith.constant 4 : index
    %c0_12 = arith.constant 0 : index
    %11 = vector.load %arg10[%c4, %c0_12] : memref<36x256xbf16, #tpu.memory_space<vmem>>, vector<4x256xbf16>
    tpu.vector_store %arg10[%c4, %c0_12], %10 {strides = array<i32>} : memref<36x256xbf16, #tpu.memory_space<vmem>>, vector<4x256xbf16>,
    %c0_13 = arith.constant 0 : index
    %c2 = arith.constant 2 : index
    %12 = vector.load %arg9[%c0_13, %c2] : memref<4x290xbf16, #tpu.memory_space<vmem>>, vector<4x256xbf16>
    %c0_14 = arith.constant 0 : index
    %c0_15 = arith.constant 0 : index
    %13 = vector.load %arg5[%c0_14, %c0_15] : memref<1x256xbf16, #tpu.memory_space<vmem>>, vector<1x256xbf16>
    %14 = vector.broadcast %13 : vector<1x256xbf16> to vector<4x256xbf16>
    %15 = arith.mulf %12, %14 : vector<4x256xbf16>
    %c8 = arith.constant 8 : index
    %c0_16 = arith.constant 0 : index
    %16 = vector.load %arg10[%c8, %c0_16] : memref<36x256xbf16, #tpu.memory_space<vmem>>, vector<4x256xbf16>
    tpu.vector_store %arg10[%c8, %c0_16], %15 {strides = array<i32>} : memref<36x256xbf16, #tpu.memory_space<vmem>>, vector<4x256xbf16>,
    %c0_17 = arith.constant 0 : index
    %c16 = arith.constant 16 : index
    %17 = vector.load %arg9[%c0_17, %c16] : memref<4x290xbf16, #tpu.memory_space<vmem>>, vector<4x256xbf16>
    %c0_18 = arith.constant 0 : index
    %c0_19 = arith.constant 0 : index
    %18 = vector.load %arg4[%c0_18, %c0_19] : memref<1x256xbf16, #tpu.memory_space<vmem>>, vector<1x256xbf16>
    %19 = vector.broadcast %18 : vector<1x256xbf16> to vector<4x256xbf16>
    %20 = arith.mulf %17, %19 : vector<4x256xbf16>
    %c12 = arith.constant 12 : index
    %c0_20 = arith.constant 0 : index
    %21 = vector.load %arg10[%c12, %c0_20] : memref<36x256xbf16, #tpu.memory_space<vmem>>, vector<4x256xbf16>
    tpu.vector_store %arg10[%c12, %c0_20], %20 {strides = array<i32>} : memref<36x256xbf16, #tpu.memory_space<vmem>>, vector<4x256xbf16>,
    %c0_21 = arith.constant 0 : index
    %c17_22 = arith.constant 17 : index
    %22 = vector.load %arg9[%c0_21, %c17_22] : memref<4x290xbf16, #tpu.memory_space<vmem>>, vector<4x256xbf16>
    %c16_23 = arith.constant 16 : index
    %c0_24 = arith.constant 0 : index
    %23 = vector.load %arg10[%c16_23, %c0_24] : memref<36x256xbf16, #tpu.memory_space<vmem>>, vector<4x256xbf16>
    tpu.vector_store %arg10[%c16_23, %c0_24], %22 {strides = array<i32>} : memref<36x256xbf16, #tpu.memory_space<vmem>>, vector<4x256xbf16>,
    %c0_25 = arith.constant 0 : index
    %c18 = arith.constant 18 : index
    %24 = vector.load %arg9[%c0_25, %c18] : memref<4x290xbf16, #tpu.memory_space<vmem>>, vector<4x256xbf16>
    %c0_26 = arith.constant 0 : index
    %c0_27 = arith.constant 0 : index
    %25 = vector.load %arg5[%c0_26, %c0_27] : memref<1x256xbf16, #tpu.memory_space<vmem>>, vector<1x256xbf16>
    %26 = vector.broadcast %25 : vector<1x256xbf16> to vector<4x256xbf16>
    %27 = arith.mulf %24, %26 : vector<4x256xbf16>
    %c20 = arith.constant 20 : index
    %c0_28 = arith.constant 0 : index
    %28 = vector.load %arg10[%c20, %c0_28] : memref<36x256xbf16, #tpu.memory_space<vmem>>, vector<4x256xbf16>
    tpu.vector_store %arg10[%c20, %c0_28], %27 {strides = array<i32>} : memref<36x256xbf16, #tpu.memory_space<vmem>>, vector<4x256xbf16>,
    %c0_29 = arith.constant 0 : index
    %c32 = arith.constant 32 : index
    %29 = vector.load %arg9[%c0_29, %c32] : memref<4x290xbf16, #tpu.memory_space<vmem>>, vector<4x256xbf16>
    %c0_30 = arith.constant 0 : index
    %c0_31 = arith.constant 0 : index
    %30 = vector.load %arg4[%c0_30, %c0_31] : memref<1x256xbf16, #tpu.memory_space<vmem>>, vector<1x256xbf16>
    %31 = vector.broadcast %30 : vector<1x256xbf16> to vector<4x256xbf16>
    %32 = arith.mulf %29, %31 : vector<4x256xbf16>
    %c24 = arith.constant 24 : index
    %c0_32 = arith.constant 0 : index
    %33 = vector.load %arg10[%c24, %c0_32] : memref<36x256xbf16, #tpu.memory_space<vmem>>, vector<4x256xbf16>
    tpu.vector_store %arg10[%c24, %c0_32], %32 {strides = array<i32>} : memref<36x256xbf16, #tpu.memory_space<vmem>>, vector<4x256xbf16>,
    %c0_33 = arith.constant 0 : index
    %c33 = arith.constant 33 : index
    %34 = vector.load %arg9[%c0_33, %c33] : memref<4x290xbf16, #tpu.memory_space<vmem>>, vector<4x256xbf16>
    %c28 = arith.constant 28 : index
    %c0_34 = arith.constant 0 : index
    %35 = vector.load %arg10[%c28, %c0_34] : memref<36x256xbf16, #tpu.memory_space<vmem>>, vector<4x256xbf16>
    tpu.vector_store %arg10[%c28, %c0_34], %34 {strides = array<i32>} : memref<36x256xbf16, #tpu.memory_space<vmem>>, vector<4x256xbf16>,
    %c0_35 = arith.constant 0 : index
    %c34 = arith.constant 34 : index
    %36 = vector.load %arg9[%c0_35, %c34] : memref<4x290xbf16, #tpu.memory_space<vmem>>, vector<4x256xbf16>
    %c0_36 = arith.constant 0 : index
    %c0_37 = arith.constant 0 : index
    %37 = vector.load %arg5[%c0_36, %c0_37] : memref<1x256xbf16, #tpu.memory_space<vmem>>, vector<1x256xbf16>
    %38 = vector.broadcast %37 : vector<1x256xbf16> to vector<4x256xbf16>
    %39 = arith.mulf %36, %38 : vector<4x256xbf16>
    %c32_38 = arith.constant 32 : index
    %c0_39 = arith.constant 0 : index
    %40 = vector.load %arg10[%c32_38, %c0_39] : memref<36x256xbf16, #tpu.memory_space<vmem>>, vector<4x256xbf16>
    tpu.vector_store %arg10[%c32_38, %c0_39], %39 {strides = array<i32>} : memref<36x256xbf16, #tpu.memory_space<vmem>>, vector<4x256xbf16>,
    %c0_40 = arith.constant 0 : index
    %c0_41 = arith.constant 0 : index
    %41 = vector.load %arg2[%c0_40, %c0_41] : memref<8x36xbf16, #tpu.memory_space<vmem>>, vector<8x36xbf16>
    %c0_42 = arith.constant 0 : index
    %c0_43 = arith.constant 0 : index
    %42 = vector.load %arg10[%c0_42, %c0_43] : memref<36x256xbf16, #tpu.memory_space<vmem>>, vector<36x256xbf16>
    %cst_44 = arith.constant dense<0.000000e+00> : vector<8x256xf32>
    %43 = tpu.matmul %41, %42, %cst_44 {dimension_numbers = #tpu.dot_dimension_numbers<[1], [0], [0], [1], [0, 0, 1, 1], [], []>} : vector<8x36xbf16>, vector<36x256xbf16>, vector<8x256xf32> -> vector<8x256xf32>
    %c0_45 = arith.constant 0 : index
    %c0_46 = arith.constant 0 : index
    %44 = vector.load %arg3[%c0_45, %c0_46] : memref<8x1xf32, #tpu.memory_space<vmem>>, vector<8x1xf32>
    %45 = vector.broadcast %44 : vector<8x1xf32> to vector<8x256xf32>
    %46 = arith.addf %43, %45 : vector<8x256xf32>
    %c0_47 = arith.constant 0 : index
    %c0_48 = arith.constant 0 : index
    %c0_49 = arith.constant 0 : index
    %47 = vector.load %arg6[%c0_47, %c0_48, %c0_49] : memref<1x8x256xf32, #tpu.memory_space<vmem>>, vector<1x8x256xf32>
    %48 = vector.shape_cast %47 : vector<1x8x256xf32> to vector<8x256xf32>
    %49 = vector.shape_cast %46 : vector<8x256xf32> to vector<1x8x256xf32>
    tpu.vector_store %arg6[%c0_47, %c0_48, %c0_49], %49 {strides = array<i32>} : memref<1x8x256xf32, #tpu.memory_space<vmem>>, vector<1x8x256xf32>,
    %cst_50 = arith.constant dense<0.000000e+00> : vector<8xf32>
    %50 = vector.multi_reduction <add>, %46, %cst_50 [1] : vector<8x256xf32> to vector<8xf32>
    %51 = vector.shape_cast %50 : vector<8xf32> to vector<8x1xf32>
    %c0_51 = arith.constant 0 : index
    %c0_52 = arith.constant 0 : index
    %c0_53 = arith.constant 0 : index
    %52 = vector.load %arg7[%c0_51, %c0_52, %c0_53] : memref<1x8x1xf32, #tpu.memory_space<vmem>>, vector<1x8x1xf32>
    %53 = vector.shape_cast %52 : vector<1x8x1xf32> to vector<8x1xf32>
    %54 = vector.shape_cast %51 : vector<8x1xf32> to vector<1x8x1xf32>
    tpu.vector_store %arg7[%c0_51, %c0_52, %c0_53], %54 {strides = array<i32>} : memref<1x8x1xf32, #tpu.memory_space<vmem>>, vector<1x8x1xf32>,
    %55 = arith.mulf %46, %46 : vector<8x256xf32>
    %cst_54 = arith.constant dense<0.000000e+00> : vector<8xf32>
    %56 = vector.multi_reduction <add>, %55, %cst_54 [1] : vector<8x256xf32> to vector<8xf32>
    %57 = vector.shape_cast %56 : vector<8xf32> to vector<8x1xf32>
    %c0_55 = arith.constant 0 : index
    %c0_56 = arith.constant 0 : index
    %c0_57 = arith.constant 0 : index
    %58 = vector.load %arg8[%c0_55, %c0_56, %c0_57] : memref<1x8x1xf32, #tpu.memory_space<vmem>>, vector<1x8x1xf32>
    %59 = vector.shape_cast %58 : vector<1x8x1xf32> to vector<8x1xf32>
    %60 = vector.shape_cast %57 : vector<8x1xf32> to vector<1x8x1xf32>
    tpu.vector_store %arg8[%c0_55, %c0_56, %c0_57], %60 {strides = array<i32>} : memref<1x8x1xf32, #tpu.memory_space<vmem>>, vector<1x8x1xf32>,
    return
  }
  func.func @transform_0(%arg0: i32) -> (i32, i32, i32) {
    %c0_i32 = arith.constant 0 : i32
    %c0_i32_0 = arith.constant 0 : i32
    %c0_i32_1 = arith.constant 0 : i32
    return %arg0, %c0_i32, %c0_i32_0 : i32, i32, i32
  }
  func.func @transform_1(%arg0: i32) -> (i32, i32) {
    %c0_i32 = arith.constant 0 : i32
    %c0_i32_0 = arith.constant 0 : i32
    %c0_i32_1 = arith.constant 0 : i32
    return %c0_i32, %c0_i32_0 : i32, i32
  }
  func.func @transform_2(%arg0: i32) -> (i32, i32) {
    %c0_i32 = arith.constant 0 : i32
    %c0_i32_0 = arith.constant 0 : i32
    %c0_i32_1 = arith.constant 0 : i32
    return %c0_i32, %c0_i32_0 : i32, i32
  }
  func.func @transform_3(%arg0: i32) -> (i32, i32) {
    %c0_i32 = arith.constant 0 : i32
    %c0_i32_0 = arith.constant 0 : i32
    %c0_i32_1 = arith.constant 0 : i32
    return %c0_i32, %c0_i32_0 : i32, i32
  }
  func.func @transform_4(%arg0: i32) -> (i32, i32) {
    %c0_i32 = arith.constant 0 : i32
    %c0_i32_0 = arith.constant 0 : i32
    %c0_i32_1 = arith.constant 0 : i32
    return %c0_i32, %c0_i32_0 : i32, i32
  }
  func.func @transform_5(%arg0: i32) -> (i32, i32, i32) {
    %c0_i32 = arith.constant 0 : i32
    %c0_i32_0 = arith.constant 0 : i32
    %c0_i32_1 = arith.constant 0 : i32
    return %arg0, %c0_i32, %c0_i32_0 : i32, i32, i32
  }
  func.func @transform_6(%arg0: i32) -> (i32, i32, i32) {
    %c0_i32 = arith.constant 0 : i32
    %c0_i32_0 = arith.constant 0 : i32
    %c0_i32_1 = arith.constant 0 : i32
    return %arg0, %c0_i32, %c0_i32_0 : i32, i32, i32
  }
  func.func @transform_7(%arg0: i32) -> (i32, i32, i32) {
    %c0_i32 = arith.constant 0 : i32
    %c0_i32_0 = arith.constant 0 : i32
    %c0_i32_1 = arith.constant 0 : i32
    return %arg0, %c0_i32, %c0_i32_0 : i32, i32, i32
  }
}

</mosaic_0001>

<bundles_post_ra>
// kernel: tpu_custom_call.1
= control target key start
LH: loop header
LB: loop body
LE: loop exit
PB: predicated region body
PF: predicated region fallthrough
CT: control target
= control target key end

     0   :  { %13 = vsyncpa [#allocation5], 0  ;;  %s1491_s0 = inlined_call_operand.vmem [shape: bf16[2,4,256], index: 0, kind: input, shape index: {}]   ;;  %s1492_s1 = inlined_call_operand.vmem [shape: bf16[8,36], index: 1, kind: input, shape index: {}]   ;;  %s1493_s2 = inlined_call_operand.vmem [shape: f32[8,1], index: 2, kind: input, shape index: {}]   ;;  %s1494_s3 = inlined_call_operand.vmem [shape: bf16[1,256], index: 3, kind: input, shape index: {}]   ;;  %s1495_s4 = inlined_call_operand.vmem [shape: bf16[1,256], index: 4, kind: input, shape index: {}]   ;;  %s1496_s5 = inlined_call_operand.hbm [shape: f32[2,8,256], index: 5, kind: output, shape index: {0}]   ;;  %s1497_s6 = inlined_call_operand.vmem [shape: f32[2,8,1], index: 6, kind: output, shape index: {1}]   ;;  %s1498_s7 = inlined_call_operand.vmem [shape: f32[2,8,1], index: 7, kind: output, shape index: {2}]  }
   0x1   :  { %15 = vsyncpa [#allocation5 + $0x1], 0  ;;  %s1337_s24 = smov 0   ;;  %s1339_s25 = smov 0  }
   0x2   :  { %s1341_s26 = smov 0   ;;  %s1343_s27 = smov 0  }
   0x3 LB: > { %s1358_s28 = sadd.s32 4294967295, %s1277_s27   ;;  %s1116_s29 = sadd.s32 4294967294, %s1277_s27   ;;  %s1277_s27 = sphi %s1343_s27, %s1504_s27   ;;  %s1273_s26 = sphi %s1341_s26, %s1503_s26   ;;  %s1269_s25 = sphi %s1339_s25, %s1502_s25   ;;  %s1265_s24 = sphi %s1337_s24, %s1501_s24  }
   0x4   : > { %s1362_s30 = sadd.s32 1, %s1277_s27   ;;  %s138_s8 = sadd.s32 1, %s1273_s26 }
   0x5   : > { %s135_s9 = ssub.s32 %s1277_s27, %s1362_s30  ;;  %p148_p0 = scmp.ne.s32.totalorder %s1273_s26, %s1269_s25 }
   0x6   : > { %p136_p1 = scmp.eq.s32.totalorder %s135_s9, 0  ;;  %p149_p2 = scmp.eq.s32.totalorder %s1358_s28, 1 }
   0x7   : > { %p154_p3 = scmp.ne.s32.totalorder %s1269_s25, %s1265_s24  ;;  %p155_p4 = scmp.eq.s32.totalorder %s1116_s29, 1 }
   0x8   : > { %s1373_s10 = scalar_select %p136_p1, %s1273_s26, %s138_s8  }
   0x9   : > { %p1375_p5 = por %p149_p2, %p148_p0  ;;  %p1379_p6 = por %p155_p4, %p154_p3 }
   0xa   : > { %p1119_p7 = scmp.ge.s32.totalorder %s1277_s27, 1  ;;  %p245_p8 = scmp.lt.s32.totalorder %s1277_s27, 3 }
   0xc   : > { %p246_p9 = pnand %p1119_p7, %p245_p8 }
   0xd   : > { %p285_p10 = scmp.lt.s32.totalorder (!%p246_p9), %s1358_s28, 1  ;;  %v332_v0 = vlaneseq (!%p246_p9)  ;;  %v1279_v1 = vmov (!%p246_p9), 1966171168   ;;  %v1280_v5 = vmov (!%p246_p9), 1983009808   ;;  %vm299_vm0 = vcmask (!%p246_p9), 1041408  }
   0xe   : > { %249 = sbr.rel (%p246_p9) target bundleno = 678 (0x2a6), region = 40  ;;  %v330_v2 = vunpack.c.l.s4 (!%p246_p9), %v1279_v1  ;;  %v1128_v3 = vld.sshfl [vmem:[%s1494_s3] sm:$0x11 pattern:$0x75316420] (!%p246_p9)  ;;  %v361_v6 = vunpack.c.l.s4 (!%p246_p9), %v1280_v5  ;;  %vm300_vm1 = vcmask (!%p246_p9), 1043458  }
   0xf   : > { %v333_v4 = vshrl.u32 (!%p246_p9), %v332_v0, 7  ;;  %v1127_v7 = vld.sshfl [vmem:[%s1495_s4] sm:$0x11 pattern:$0x75316420] (!%p246_p9)  ;;  %v501_v9 = vcombine.high (!%p246_p9), %v1128_v3, %v1128_v3  ;;  %vm302_vm2 = vcmask (!%p246_p9), 275460   ;;  %vm301_vm3 = vmor (!%p246_p9), %vm300_vm1, %vm299_vm0 }
  0x10   : > { %v331_v8 = vunpack.c.0.s8 (!%p246_p9), %v330_v2  ;;  %v418_v10 = vcombine.high (!%p246_p9), %v1127_v7, %v1127_v7  ;;  %v1281_v12 = vmov (!%p246_p9), 0   ;;  %v362_v15 = vunpack.c.0.s8 (!%p246_p9), %v361_v6  ;;  %vm303_vm4 = vmor (!%p246_p9), %vm302_vm2, %vm301_vm3  ;;  %s1282_s22 = smov (!%p246_p9), 17   ;;  %s1283_s23 = smov (!%p246_p9), 16  }
  0x11   : > { %958 = vmatprep.mubr.bf16.mxu0 (!%p246_p9), %v1281_v12  ;;  %1203 = vset.pattern.permute.xlu0 (!%p246_p9), %v1281_v12  ;;  %v348_v14 = vsub.s32 (!%p246_p9), 0, %v333_v4  ;;  %304 = vst.msk [vmem:[#allocation2] sm:$0x3f] (!%p246_p9), %vm303_vm4, %v1281_v12  ;;  %s1284_s29 = smov (!%p246_p9), 2   ;;  %s1285_s8 = smov (!%p246_p9), 18   ;;  %vm313_vm5 = vcmask (!%p246_p9), 1041544  }
  0x12   : > { %v334_v11 = vsub.s32 (!%p246_p9), %v331_v8, %v333_v4  ;;  %v1401_v24 = vsub.s32 (!%p246_p9), %v362_v15, %v333_v4  ;;  %s1286_s9 = smov (!%p246_p9), 32   ;;  %s1287_s13 = smov (!%p246_p9), 34   ;;  %vm314_vm6 = vmor (!%p246_p9), %vm300_vm1, %vm313_vm5  ;;  %vm315_vm7 = vcmask (!%p246_p9), 136196   ;;  %vm310_vm8 = vcmask (!%p246_p9), 138240  }
  0x13   : > { %vm316_vm9 = vmor (!%p246_p9), %vm315_vm7, %vm314_vm6  ;;  %vm543_vm10 = vcmask (!%p246_p9), 130048   ;;  %vm460_vm11 = vcmask (!%p246_p9), 15360   ;;  %s1288_s14 = smov (!%p246_p9), 111   ;;  %s1289_s16 = smov (!%p246_p9), 127   ;;  %vm654_vm12 = vcmask (!%p246_p9), 146432   ;;  %vm737_vm13 = vcmask (!%p246_p9), 261120  }
  0x14   : > { %v508_v16 = vrot.slane (!%p246_p9), %v1128_v3, %v334_v11  ;;  %v515_v17 = vrot.slane (!%p246_p9), %v501_v9, %v334_v11  ;;  %v425_v18 = vrot.slane (!%p246_p9), %v1127_v7, %v334_v11  ;;  %v432_v19 = vrot.slane (!%p246_p9), %v418_v10, %v334_v11  ;;  %s1290_s17 = smov (!%p246_p9), 95   ;;  %s1292_s19 = smov (!%p246_p9), 126  }
  0x15   : > { %s1390_s15 = scalar_select %p285_p10, %s1358_s28, 1  ;;  %vm848_vm14 = vcmask 277504   ;;  %vm402_vm15 = vcmask 1043456   ;;  %vm404_vm1 = vcmask 1039360   ;;  %vm598_vm2 = vcmask 908288  }
  0x16   : > { %v517_v20 = vpack.i.b16 %v508_v16, %v508_v16  ;;  %v524_v21 = vpack.i.b16 %v515_v17, %v515_v17  ;;  %v434_v22 = vpack.i.b16 %v425_v18, %v425_v18  ;;  %v441_v23 = vpack.i.b16 %v432_v19, %v432_v19  ;;  %s1293_s20 = smov 110  }
  0x17   : > { %s1145_s18 = sshll.u32 %s1390_s15, 2  ;;  %vm792_vm3 = vcmask 777216   ;;  %vm487_vm4 = vcmask 1031168   ;;  %vm570_vm5 = vcmask 916480   ;;  %vm764_vm6 = vcmask 785408  }
  0x18   : > { %s289_s21 = scalar_lea.vmem %s1491_s0, %s1145_s18  ;;  %v522_v25 = vrot.slane %v517_v20, %v348_v14  ;;  %v529_v26 = vrot.slane %v524_v21, %v348_v14  ;;  %v439_v27 = vrot.slane %v434_v22, %v348_v14  ;;  %v446_v28 = vrot.slane %v441_v23, %v348_v14  ;;  %s1291_s18 = smov 112  }
  0x19   : > { %v305_v13 = vld [vmem:[%s289_s21] sm:$0xf]  ;;  %s1294_s21 = smov 96   ;;  %vm681_vm7 = vcmask 900096  }
  0x1a   : > { %307 = vrot.lane.b32.xlu0 %v305_v13, %s1282_s22  ;;  %v532_v29 = vcombine.low %v522_v25, %v529_v26  ;;  %v449_v30 = vcombine.low %v439_v27, %v446_v28  ;;  %s1295_s22 = smov 94   ;;  %v885_v27 = vld [vmem:[%s1493_s2] sm:$0xff] }
  0x1c   : > { %v1404_v31 = vrot.slane %v532_v29, %v1401_v24  ;;  %v456_v32 = vrot.slane %v449_v30, %v1401_v24 }
  0x1e   : > { %540 = vrot.lane.b32.xlu1 %v1404_v31, %s1283_s23  ;;  %457 = vrot.lane.b32.xlu0 %v456_v32, %s1284_s29  ;;  %s1296_s29 = smov [#allocation4]  }
  0x22   : > { %651 = vrot.lane.b32.xlu1 %v456_v32, %s1285_s8  ;;  %734 = vrot.lane.b32.xlu0 %v1404_v31, %s1286_s9  ;;  %s1219_s8 = sshll.u32 %s1296_s29, 4  ;;  %s1220_s8 = int_to_ptr.vmem [resolvable:$false] %s1219_s8 }
  0x23   : > { %s1221_s9 = scalar_lea.vmem %s1220_s8, 512 }
  0x26   : > { %845 = vrot.lane.b32.xlu1 %v456_v32, %s1287_s13  ;;  %s270_s13 = sand.u32 1, %s1269_s25  }
  0x8c   : > { %v308_v33 = vpop.permute.xlu0 %307 }
  0x8d   : > { %v309_v34 = vrot.slane %v308_v33, 6 }
  0x8f   : > { %v311_v35 = vsel %vm310_vm8, %v309_v34, %v308_v33  ;;  %vm875_vm8 = vcmask 769024  }
  0x90   : > { %317 = vst.msk [vmem:[#allocation2] sm:$0x3f] %vm316_vm9, %v311_v35  ;;  %v541_v36 = vpop.permute.xlu1 %540  ;;  %v458_v37 = vpop.permute.xlu0 %457  ;;  %vm916_vm9 = vcmask 293888  }
  0x91   : > { %v542_v38 = vrot.slane %v541_v36, 6  ;;  %v459_v43 = vrot.slane %v458_v37, 6 }
  0x93   : > { %v544_v48 = vsel %vm543_vm10, %v542_v38, %v541_v36  ;;  %v461_v53 = vsel %vm460_vm11, %v459_v43, %v458_v37 }
  0x94   : > { %v652_v46 = vpop.permute.xlu1 %651  ;;  %v735_v47 = vpop.permute.xlu0 %734 }
  0x95   : > { %v653_v54 = vrot.slane %v652_v46, 6  ;;  %v736_v55 = vrot.slane %v735_v47, 6 }
  0x97   : > { %v574_v39 = vld [vmem:[#allocation2] sm:$0x3f]  ;;  %v655_v0 = vsel %vm654_vm12, %v653_v54, %v652_v46  ;;  %v738_v1 = vsel %vm737_vm13, %v736_v55, %v735_v47 }
  0x98   : > { %v379_v40 = vld [vmem:[#allocation2] sm:$0x3f]  ;;  %v583_v41 = vrot.slane %v574_v39, %v1401_v24  ;;  %v576_v51 = vcombine.high %v574_v39, %v574_v39  ;;  %v846_v2 = vpop.permute.xlu1 %845 }
  0x99   : > { %v395_v42 = vrot.slane %v379_v40, %v1401_v24  ;;  %v768_v44 = vld [vmem:[#allocation2] sm:$0x3f]  ;;  %v381_v45 = vcombine.low %v379_v40, %v379_v40  ;;  %v847_v9 = vrot.slane %v846_v2, 6 }
  0x9a   : > { %591 = vrot.lane.b32.xlu0 %v583_v41, %s1288_s14  ;;  %v784_v49 = vrot.slane %v768_v44, %v1401_v24  ;;  %v770_v52 = vcombine.low %v768_v44, %v768_v44  ;;  %v318_v56 = vld [vmem:[#allocation2] sm:$0xf]  ;;  %v590_v61 = vrot.slane %v576_v51, %v1401_v24 }
  0x9b   : > { %398 = vrot.lane.b32.xlu1 %v395_v42, %s1289_s16  ;;  %v388_v50 = vrot.slane %v381_v45, %v1401_v24  ;;  %v491_v57 = vld [vmem:[#allocation2] sm:$0x3f]  ;;  %v368_v63 = vmul.bf16 %v1404_v31, %v318_v56  ;;  %v849_v14 = vsel %vm848_vm14, %v847_v9, %v846_v2 }
  0x9c   : > { %v546_v58 = vmul.bf16 %v544_v48, %v491_v57  ;;  %v408_v59 = vld [vmem:[#allocation2] sm:$0x3f]  ;;  %v777_v62 = vrot.slane %v770_v52, %v1401_v24 }
  0x9d   : > { %v463_v60 = vmul.bf16 %v461_v53, %v408_v59  ;;  %1126 = vst.sshfl [vmem:[#allocation3] sm:$0xf pattern:$0x76325410] %v368_v63  ;;  %v602_v3 = vld [vmem:[#allocation2] sm:$0x3f] }
  0x9e   : > { %396 = vrot.lane.b32.xlu0 %v388_v50, %s1289_s16  ;;  %v685_v4 = vld [vmem:[#allocation2] sm:$0x3f]  ;;  %v657_v5 = vmul.bf16 %v655_v0, %v602_v3  ;;  %v562_v7 = vrot.slane %v546_v58, %v1401_v24  ;;  %v548_v11 = vcombine.low %v546_v58, %v546_v58 }
  0x9f   : > { %787 = vrot.lane.b32.xlu1 %v784_v49, %s1290_s17  ;;  %v740_v6 = vmul.bf16 %v738_v1, %v685_v4  ;;  %v472_v8 = vrot.slane %v463_v60, %v1401_v24  ;;  %v465_v10 = vcombine.high %v463_v60, %v463_v60  ;;  %v796_v15 = vld [vmem:[#allocation2] sm:$0x3f] }
  0xa0   : > { %v673_v12 = vrot.slane %v657_v5, %v1401_v24  ;;  %v659_v17 = vcombine.low %v657_v5, %v657_v5  ;;  %v851_v19 = vmul.bf16 %v849_v14, %v796_v15  ;;  %v555_v20 = vrot.slane %v548_v11, %v1401_v24 }
  0xa1   : > { %v749_v13 = vrot.slane %v740_v6, %v1401_v24  ;;  %v479_v16 = vrot.slane %v465_v10, %v1401_v24  ;;  %v742_v18 = vcombine.high %v740_v6, %v740_v6 }
  0xa2   : > { %785 = vrot.lane.b32.xlu0 %v777_v62, %s1290_s17  ;;  %v853_v21 = vcombine.high %v851_v19, %v851_v19  ;;  %v666_v22 = vrot.slane %v659_v17, %v1401_v24  ;;  %v860_v25 = vrot.slane %v851_v19, %v1401_v24  ;;  %v879_v19 = vld [vmem:[%s1492_s1] sm:$0xf]  ;;  %s1146_s17 = sshll.u32 %s1358_s28, 8 }
  0xa3   : > { %593 = vrot.lane.b32.xlu1 %v590_v61, %s1288_s14  ;;  %v756_v23 = vrot.slane %v742_v18, %v1401_v24  ;;  %s1120_s14 = sshll.u32 %s270_s13, 4 }
  0xa4   : > { %v867_v26 = vrot.slane %v853_v21, %v1401_v24  ;;  %s272_s16 = scalar_lea.vmem [#allocation4], %s1120_s14 }
  0xa6   : > { %480 = vrot.lane.b32.xlu0 %v472_v8, %s1292_s19 }
  0xa7   : > { %565 = vrot.lane.b32.xlu1 %v562_v7, %s1291_s18 }
  0xaa   : > { %757 = vrot.lane.b32.xlu0 %v749_v13, %s1294_s21 }
  0xab   : > { %676 = vrot.lane.b32.xlu1 %v673_v12, %s1293_s20 }
  0xae   : > { %563 = vrot.lane.b32.xlu0 %v555_v20, %s1291_s18 }
  0xaf   : > { %482 = vrot.lane.b32.xlu1 %v479_v16, %s1292_s19 }
  0xb2   : > { %674 = vrot.lane.b32.xlu0 %v666_v22, %s1293_s20  ;;  %s1448_s20 = scalar_lea.hbm %s1496_s5, %s1146_s17 }
  0xb3   : > { %759 = vrot.lane.b32.xlu1 %v756_v23, %s1294_s21  ;;  %s1003_s21 = sshll.u32 %s272_s16, 4  ;;  %s1004_s21 = int_to_ptr.vmem [resolvable:$true] %s1003_s21 }
  0xb4   : > { %s1215_s23 = scalar_lea.vmem %s1004_s21, 256  ;;  %p1222_p0 = scmp.lt.s32.totalorder %s1004_s21, %s1220_s8 }
  0xb5   : > { %p1216_p11 = scmp.ne.s32.totalorder %s1004_s21, %s1215_s23  ;;  %p1223_p1 = scmp.lt.s32.totalorder %s1221_s9, %s1215_s23 }
  0xb6   : > { %868 = vrot.lane.b32.xlu0 %v860_v25, %s1295_s22 }
  0xb7   : > { %870 = vrot.lane.b32.xlu1 %v867_v26, %s1295_s22  ;;  %s981_s22 = scalar_lea.sflag [#allocation5], %s270_s13  ;;  %p1217_p12 = pnand %p1216_p11, %p1375_p5 }
  0xb8   : > { %p1224_p2 = por %p1223_p1, %p1222_p0 }
  0xb9   : > { %p1218_p13 = pneg %p1217_p12 }
  0xba   : > { %888 = vperm.xlu0 %1203, %v885_v27  }
  0xbb   : > { %p1225_p3 = pnand %p1224_p2, %p1218_p13 }
 0x10c   : > { %v592_v29 = vpop.permute.xlu0 %591 }
 0x10d   : > { %v399_v28 = vpop.permute.xlu1 %398  ;;  %v595_v37 = vrot.slane %v592_v29, 4 }
 0x10e   : > { %v401_v32 = vrot.slane %v399_v28, 4 }
 0x110   : > { %v397_v31 = vpop.permute.xlu0 %396 }
 0x111   : > { %v788_v30 = vpop.permute.xlu1 %787  ;;  %v400_v33 = vrot.slane %v397_v31, 4 }
 0x112   : > { %v790_v38 = vrot.slane %v788_v30, 4 }
 0x113   : > { %v403_v34 = vsel %vm402_vm15, %v400_v33, %v401_v32 }
 0x114   : > { %v405_v35 = vsel %vm404_vm1, %v397_v31, %v403_v34  ;;  %v786_v36 = vpop.permute.xlu0 %785 }
 0x115   : > { %v594_v24 = vpop.permute.xlu1 %593  ;;  %407 = vst [vmem:[#allocation3] sm:$0xcc] %v405_v35  ;;  %v789_v40 = vrot.slane %v786_v36, 4 }
 0x116   : > { %v596_v39 = vrot.slane %v594_v24, 4 }
 0x117   : > { %v791_v42 = vsel %vm402_vm15, %v789_v40, %v790_v38 }
 0x118   : > { %v597_v41 = vsel %vm402_vm15, %v595_v37, %v596_v39  ;;  %v793_v44 = vsel %vm792_vm3, %v786_v36, %v791_v42  ;;  %v481_v46 = vpop.permute.xlu0 %480 }
 0x119   : > { %v599_v43 = vsel %vm598_vm2, %v592_v29, %v597_v41  ;;  %v566_v45 = vpop.permute.xlu1 %565  ;;  %795 = vst [vmem:[#allocation3 + $0x18] sm:$0xcc] %v793_v44  ;;  %v484_v52 = vrot.slane %v481_v46, 4 }
 0x11a   : > { %601 = vst [vmem:[#allocation3 + $0x10] sm:$0x33] %v599_v43  ;;  %v568_v51 = vrot.slane %v566_v45, 4 }
 0x11c   : > { %v758_v48 = vpop.permute.xlu0 %757 }
 0x11d   : > { %v677_v47 = vpop.permute.xlu1 %676  ;;  %v761_v62 = vrot.slane %v758_v48, 4 }
 0x11e   : > { %v679_v61 = vrot.slane %v677_v47, 4 }
 0x120   : > { %v564_v50 = vpop.permute.xlu0 %563 }
 0x121   : > { %v483_v49 = vpop.permute.xlu1 %482  ;;  %v567_v54 = vrot.slane %v564_v50, 4 }
 0x122   : > { %v485_v53 = vrot.slane %v483_v49, 4 }
 0x123   : > { %v569_v56 = vsel %vm402_vm15, %v567_v54, %v568_v51 }
 0x124   : > { %v486_v55 = vsel %vm402_vm15, %v484_v52, %v485_v53  ;;  %v571_v58 = vsel %vm570_vm5, %v564_v50, %v569_v56  ;;  %v675_v60 = vpop.permute.xlu0 %674 }
 0x125   : > { %v488_v57 = vsel %vm487_vm4, %v481_v46, %v486_v55  ;;  %v760_v59 = vpop.permute.xlu1 %759  ;;  %573 = vst [vmem:[#allocation3 + $0x8] sm:$0xcc] %v571_v58  ;;  %v678_v0 = vrot.slane %v675_v60, 4 }
 0x126   : > { %490 = vst [vmem:[#allocation3 + $0x8] sm:$0x33] %v488_v57  ;;  %v762_v63 = vrot.slane %v760_v59, 4 }
 0x127   : > { %v680_v2 = vsel %vm402_vm15, %v678_v0, %v679_v61 }
 0x128   : > { %v763_v1 = vsel %vm402_vm15, %v761_v62, %v762_v63  ;;  %v682_v4 = vsel %vm681_vm7, %v675_v60, %v680_v2  ;;  %v869_v6 = vpop.permute.xlu0 %868 }
 0x129   : > { %v765_v3 = vsel %vm764_vm6, %v758_v48, %v763_v1  ;;  %v871_v5 = vpop.permute.xlu1 %870  ;;  %684 = vst [vmem:[#allocation3 + $0x10] sm:$0xcc] %v682_v4  ;;  %v872_v8 = vrot.slane %v869_v6, 4 }
 0x12a   : > { %767 = vst [vmem:[#allocation3 + $0x18] sm:$0x33] %v765_v3  ;;  %v873_v7 = vrot.slane %v871_v5, 4 }
 0x12c   : > { %v874_v9 = vsel %vm402_vm15, %v872_v8, %v873_v7 }
 0x12d   : > { %v876_v10 = vsel %vm875_vm8, %v869_v6, %v874_v9  ;;  %v1207_v11 = vld [vmem:[#allocation3 + $0x4] ss:$8 sps:$4 sm:$0xff]   ;;  %v1209_v12 = vld [vmem:[#allocation3] ss:$8 sps:$4 sm:$0xff]  }
 0x12e   : > { %878 = vst [vmem:[#allocation3 + $0x20] sm:$0x33] %v876_v10  ;;  %926 = vmatprep.subr.bf16.mxu0 %v1207_v11 }
 0x12f   : > { %927 = vmatpush1.bf16.msra.mxu0 %v1209_v12 }
 0x131   : > { %v1210_v13 = vld [vmem:[#allocation3 + $0x14] ss:$8 sps:$4 sm:$0xff]   ;;  %v1212_v14 = vld [vmem:[#allocation3 + $0x10] ss:$8 sps:$4 sm:$0xff]  }
 0x132   : > { %928 = vmatprep.subr.bf16.mxu0 %v1210_v13 }
 0x133   : > { %929 = vmatpush1.bf16.msra.mxu0 %v1212_v14 }
 0x135   : > { %v884_v15 = vld [vmem:[#allocation3 + $0x20] sm:$0x33] }
 0x136   : > { %v1137_v16 = vcombine.high %v884_v15, %v884_v15  ;;  %v1136_v17 = vcombine.low %v884_v15, %v884_v15 }
 0x138   : > { %1138 = vmatprep.subr.msk.bf16.mxu0 %vm299_vm0, %v1137_v16  ;;  %v921_v18 = vsel %vm299_vm0, %v1136_v17, 0 }
 0x139   : > { %931 = vmatpush1.bf16.msra.mxu0 %v921_v18  ;;  %v889_v20 = vpop.permute.xlu0 %888 }
 0x13c   : > { %1139 = vmatmul.mubr.msk.bf16.vlgmr.msra.gmra.mrb[0].mxu0 %vm916_vm9, %v879_v19 }
 0x20f   : > { %v960_v21 = vpop.f32.mrb[0].mxu0 }
 0x210   : > { %v961_v22 = vadd.f32 %v960_v21, %v889_v20  ;;  %v962_v23 = vpop.f32.mrb[1].mxu0 }
 0x211   : > { %v963_v25 = vadd.f32 %v962_v23, %v889_v20  ;;  %v964_v26 = vpop.f32.mrb[2].mxu0 }
 0x212   : > { %967 = vst [vmem:[%s272_s16] sm:$0xff] %v961_v22  ;;  %v965_v27 = vpop.f32.mrb[3].mxu0  ;;  %v974_v28 = vmul.f32 %v961_v22, %v961_v22 }
 0x213   : > { %968 = vst [vmem:[%s272_s16 + $0x8] sm:$0xff] %v963_v25  ;;  %v969_v29 = vadd.f32 %v963_v25, %v961_v22  ;;  %v975_v30 = vmul.f32 %v963_v25, %v963_v25 }
 0x215   : > { %970 = vadd.xlane.f32.xlu1 %v969_v29  ;;  %v976_v31 = vadd.f32 %v975_v30, %v974_v28 }
 0x217   : > { %977 = vadd.xlane.f32.xlu0 %v976_v31 }
 0x218   : > { %1228 = shalt.err (!%p1225_p3)
}
 0x219   : > { %s1229_s28 = scalar_lea.hbm %s1448_s20, 256  ;;  %s1233_s16 = scalar_lea.hbm %s1496_s5, 512 }
 0x21a   : > { %p1230_p4 = scmp.ne.s32.totalorder %s1448_s20, %s1229_s28  ;;  %p1234_p9 = scmp.lt.u32.totalorder %s1448_s20, %s1496_s5 }
 0x21b   : > { %p1235_p10 = scmp.lt.u32.totalorder %s1233_s16, %s1229_s28  ;;  %p1237_p12 = scmp.lt.u32.totalorder %s1229_s28, %s1448_s20 }
 0x21c   : > { %p1231_p7 = pnand %p1230_p4, %p1375_p5 }
 0x21d   : > { %p1236_p11 = por %p1235_p10, %p1234_p9 }
 0x21e   : > { %p1232_p8 = pneg %p1231_p7 }
 0x21f   : > { %p1238_p13 = por %p1237_p12, %p1236_p11 }
 0x221   : > { %p1239_p0 = pnand %p1238_p13, %p1232_p8 }
 0x223   : > { %1242 = shalt.err (!%p1239_p0)
}
 0x224   : > { %1147 = dma.vmem_to_hbm [thread:$0]  (%p1375_p5), %s1004_s21, 256, %s1448_s20, %s981_s22   ;;  %vm972_vm0 = vcmask 7168  }
 0x225   : > { %s1123_s19 = sshll.u32 %s1390_s15, 3 }
 0x226   : > { %s293_s8 = scalar_lea.vmem %s1497_s6, %s1123_s19  ;;  %s297_s14 = scalar_lea.vmem %s1498_s7, %s1123_s19 }
 0x2a2   : > { %v971_v32 = vpop.xlane.xlu1 %970 }
 0x2a3   : > { %973 = vst.msk [vmem:[%s293_s8] sm:$0xff] %vm972_vm0, %v971_v32 }
 0x2a4   : > { %v978_v33 = vpop.xlane.xlu0 %977 }
 0x2a5   : > { %979 = vst.msk [vmem:[%s297_s14] sm:$0xff] %vm972_vm0, %v978_v33 }
 0x2a6 PF: > { %p1153_p1 = scmp.ge.s32.totalorder %s1277_s27, 2  ;;  %s1021_s11 = sand.u32 1, %s1265_s24  }
 0x2a7   : > { %s1022_s15 = scalar_lea.sflag [#allocation5], %s1021_s11 }
 0x2a8   : > { %p1150_p5 = pnand %p1153_p1, %p1379_p6 }
 0x2aa   : > { %1260 = dma.done.wait (!%p1150_p5), %s1022_s15, 256  }
 0x2ab   : > { %1262 = vsyncadd (!%p1150_p5), %s1022_s15, 4294967040  ;;  %p18_p2 = scmp.ge.s32.totalorder %s1362_s30, 4   ;;  %s1501_s24 = smov %s1269_s25 }
 0x2ac   : > { %s1502_s25 = smov %s1273_s26  ;;  %s1503_s26 = smov %s1373_s10 }
 0x2ad   : > { %s1504_s27 = smov %s1362_s30  ;;  %20 = sbr.rel (!%p18_p2) target bundleno = 3 (0x3), region = 99 }
 0x2b4   :  { %1041 = vsyncpa [#allocation5], 1 }
 0x2b5   :  { %1043 = vsyncpa [#allocation5 + $0x1], 1 }

</bundles_post_ra>
